<compile_context>
chip_gen: v7x
topology: tpu7x:2x2x1
jax: 0.10.0
libtpu: 0.0.40
codegen_flags: <defaults>
</compile_context>

<pallas_src>
import functools

import jax
import jax.numpy as jnp
from jax.experimental import pallas as pl
from jax.experimental.pallas import tpu as pltpu


def _round_up(a: int, b: int) -> int:
    return (a + b - 1) // b * b


def _device_kind() -> str:
    try:
        return jax.devices()[0].device_kind.lower()
    except Exception:
        return ""


def _vmem_capacity_bytes() -> int:
    try:
        return int(pltpu.get_tpu_info().vmem_capacity_bytes)
    except Exception:
        kind = _device_kind()
        return (64 if "v7" in kind else 128) * 1024 * 1024


def _vmem_limit(need_bytes: int, cap_bytes: int) -> int:
    # Leave headroom below the physical ceiling for Mosaic internal scratch.
    return int(min(cap_bytes - (8 << 20),
                   max(int(need_bytes * 1.2) + (8 << 20), 32 << 20)))


# --------------------------------------------------------------------------
# Kernels
# --------------------------------------------------------------------------
def _residual_ff_kernel(x_ref, w1_ref, b1_ref, w2_ref, b2_ref, o_ref, *,
                        bf16_epilogue: bool):
    """o = gelu(x @ W1 + b1) @ W2 + b2 + x for one (tm, Dp) row tile.

    Weights fully resident in VMEM (single-buffered).  MXU operands bf16,
    accumulation f32; residual add in f32 from the original x tile.
    """
    xv = x_ref[...]                                    # single vld of the tile
    x_f32 = xv.astype(jnp.float32)                     # residual copy
    x_mxu = xv.astype(jnp.bfloat16)                    # MXU LHS

    h = jnp.dot(x_mxu, w1_ref[...],
                preferred_element_type=jnp.float32)    # (tm, Hp)  MXU
    h = h + b1_ref[...]
    if bf16_epilogue:                                  # v6e/v7x small-Dp path
        h = jax.nn.gelu(h.astype(jnp.bfloat16))
    else:
        h = jax.nn.gelu(h).astype(jnp.bfloat16)

    y = jnp.dot(h, w2_ref[...],
                preferred_element_type=jnp.float32)    # (tm, Dp)  MXU
    o_ref[...] = (y + b2_ref[...] + x_f32).astype(o_ref.dtype)


def _residual_ff_htiled_kernel(x_ref, w1_ref, b1_ref, w2_ref, b2_ref, o_ref,
                               acc_ref, *, bf16_epilogue: bool):
    """Hidden-dim tiled variant: W1 blocked on its N dim, W2 on its K dim,
    second-matmul partials accumulated in an f32 VMEM scratch."""
    hk = pl.program_id(1)

    @pl.when(hk == 0)
    def _():
        acc_ref[...] = jnp.zeros_like(acc_ref)

    xv = x_ref[...]
    x_mxu = xv.astype(jnp.bfloat16)

    h = jnp.dot(x_mxu, w1_ref[...],
                preferred_element_type=jnp.float32) + b1_ref[...]
    if bf16_epilogue:
        h = jax.nn.gelu(h.astype(jnp.bfloat16))
    else:
        h = jax.nn.gelu(h).astype(jnp.bfloat16)

    acc_ref[...] += jnp.dot(h, w2_ref[...],
                            preferred_element_type=jnp.float32)

    @pl.when(hk == pl.num_programs(1) - 1)
    def _():
        o_ref[...] = (acc_ref[...] + b2_ref[...]
                      + xv.astype(jnp.float32)).astype(o_ref.dtype)


# --------------------------------------------------------------------------
# Wrapper
# --------------------------------------------------------------------------
def prepare_ff_params(w1, b1, w2, b2):
    """Pad to lane-dense (128-multiple) shapes and cast weights to bf16 ONCE.

    Zero padding is exact: gelu(0)=0 hits zero rows of W2, and padded output
    lanes stay exactly 0 and are sliced off by the wrapper.
    """
    D, H = w1.shape
    Dp, Hp = _round_up(D, 128), _round_up(H, 128)
    w1p = jnp.pad(jnp.asarray(w1, jnp.float32),
                  ((0, Dp - D), (0, Hp - H))).astype(jnp.bfloat16)
    w2p = jnp.pad(jnp.asarray(w2, jnp.float32),
                  ((0, Hp - H), (0, Dp - D))).astype(jnp.bfloat16)
    b1p = jnp.pad(jnp.asarray(b1, jnp.float32), (0, Hp - H)).reshape(1, Hp)
    b2p = jnp.pad(jnp.asarray(b2, jnp.float32), (0, Dp - D)).reshape(1, Dp)
    return dict(w1=w1p, b1=b1p, w2=w2p, b2=b2p, D=D, H=H, Dp=Dp, Hp=Hp)


def residual_feedforward(x, params, *, tm=None, th=512,
                         bf16_epilogue=None, force_h_tiled=False):
    """x: (B, N, D) -> Residual(FeedForward)(x): (B, N, D)."""
    B, N, D = x.shape
    assert D == params["D"], "x feature dim must match prepared weights"
    Dp, Hp = params["Dp"], params["Hp"]
    M = B * N

    kind = _device_kind()
    vmem_cap = _vmem_capacity_bytes()

    # Row tile: 512 on 128-MiB-VMEM parts (v5e/v6e), 256 on v7x (64 MiB).
    if tm is None:
        tm = 256 if "v7" in kind else 512
    tm = max(16, min(tm, _round_up(M, 16)))   # >=16: full bf16 packed sublanes
    tm = _round_up(tm, 16)

    # x: pad lanes only when D itself needs it; the M remainder is handled by
    # a ragged last grid block (masked stores), no padded (Mp, Dp) copy.
    x2d = x.reshape(M, D)
    if Dp != D:
        x2d = jnp.pad(x2d, ((0, 0), (0, Dp - D)))
    num_m = pl.cdiv(M, tm)

    itemsize = x.dtype.itemsize
    weight_bytes = (Dp * Hp + Hp * Dp) * 2 + (Hp + Dp) * 4
    resident_need = (
        2 * tm * Dp * itemsize        # x   (double-buffered)
        + 2 * tm * Dp * itemsize      # out (double-buffered)
        + weight_bytes                # single-buffered weights/biases
        + tm * Hp * 6                 # h f32 + bf16 temporaries
        + tm * Dp * 10)               # x f32/bf16 copies + f32 y
    use_h_tiled = (force_h_tiled
                   or weight_bytes > (40 << 20)
                   or resident_need > vmem_cap - (8 << 20))

    if bf16_epilogue is None:
        # bf16 VPU/EUP only on v6e/v7x; only worth it when MXU work per row
        # (prop. to Dp) is small enough that the GELU epilogue is binding.
        bf16_epilogue = Dp <= 256 and (("v6" in kind) or ("v7" in kind))

    cost = pl.CostEstimate(
        flops=int(4 * M * Dp * Hp),            # two matmuls: 2*M*D*H each
        transcendentals=int(M * Hp),           # tanh inside gelu
        bytes_accessed=int(2 * M * Dp * itemsize + weight_bytes))
    out_shape = jax.ShapeDtypeStruct((M, Dp), x.dtype)

    if not use_h_tiled:
        out2d = pl.pallas_call(
            functools.partial(_residual_ff_kernel, bf16_epilogue=bf16_epilogue),
            out_shape=out_shape,
            grid_spec=pltpu.PrefetchScalarGridSpec(
                num_scalar_prefetch=0,
                grid=(num_m,),
                in_specs=[
                    pl.BlockSpec((tm, Dp), lambda i: (i, 0)),   # x row tile
                    pl.BlockSpec((Dp, Hp), lambda i: (0, 0),    # W1 resident
                                 pipeline_mode=pl.Buffered(1)),
                    pl.BlockSpec((1, Hp), lambda i: (0, 0),     # b1 resident
                                 pipeline_mode=pl.Buffered(1)),
                    pl.BlockSpec((Hp, Dp), lambda i: (0, 0),    # W2 resident
                                 pipeline_mode=pl.Buffered(1)),
                    pl.BlockSpec((1, Dp), lambda i: (0, 0),     # b2 resident
                                 pipeline_mode=pl.Buffered(1)),
                ],
                out_specs=pl.BlockSpec((tm, Dp), lambda i: (i, 0)),
            ),
            compiler_params=pltpu.CompilerParams(
                dimension_semantics=("parallel",),
                vmem_limit_bytes=_vmem_limit(resident_need, vmem_cap)),
            cost_estimate=cost,
        )(x2d, params["w1"], params["b1"], params["w2"], params["b2"])
    else:
        # Hidden-dim tiled fallback.
        th = min(th, Hp)
        th = max(128, th - th % 128)
        while Hp % th:
            th -= 128
        num_h = Hp // th
        tiled_need = (
            4 * tm * Dp * itemsize
            + 2 * (Dp * th + th * Dp) * 2 + 2 * th * 4 + Dp * 4
            + tm * Dp * 4                  # f32 accumulator scratch
            + tm * th * 6 + tm * Dp * 10)
        out2d = pl.pallas_call(
            functools.partial(_residual_ff_htiled_kernel,
                              bf16_epilogue=bf16_epilogue),
            out_shape=out_shape,
            grid_spec=pltpu.PrefetchScalarGridSpec(
                num_scalar_prefetch=0,
                grid=(num_m, num_h),
                in_specs=[
                    pl.BlockSpec((tm, Dp), lambda i, h: (i, 0)),  # x (row-res.)
                    pl.BlockSpec((Dp, th), lambda i, h: (0, h)),  # W1 col block
                    pl.BlockSpec((1, th), lambda i, h: (0, h)),   # b1 block
                    pl.BlockSpec((th, Dp), lambda i, h: (h, 0)),  # W2 row block
                    pl.BlockSpec((1, Dp), lambda i, h: (0, 0),    # b2 resident
                                 pipeline_mode=pl.Buffered(1)),
                ],
                out_specs=pl.BlockSpec((tm, Dp), lambda i, h: (i, 0)),
                scratch_shapes=[pltpu.VMEM((tm, Dp), jnp.float32)],
            ),
            compiler_params=pltpu.CompilerParams(
                dimension_semantics=("parallel", "arbitrary"),
                vmem_limit_bytes=_vmem_limit(tiled_need, vmem_cap)),
            cost_estimate=cost,
        )(x2d, params["w1"], params["b1"], params["w2"], params["b2"])

    out = out2d[:, :D] if Dp != D else out2d
    return out.reshape(B, N, D)


def residual_feedforward_ref(x, w1, b1, w2, b2):
    """Pure-JAX f32 reference: fn(x) + x, fn = Linear->GELU->Linear."""
    h = jax.nn.gelu(jnp.einsum("bnd,dh->bnh", x, w1) + b1)
    return jnp.einsum("bnh,hd->bnd", h, w2) + b2 + x


if __name__ == "__main__":
    # Small, deterministic setup: batch=2, seq=8, dim=64, hidden=256.
    B, N, D, H = 2, 8, 64, 256
    key = jax.random.PRNGKey(0)
    kx, k1, kb1, k2, kb2 = jax.random.split(key, 5)

    x = jax.random.normal(kx, (B, N, D), dtype=jnp.float32)
    w1 = jax.random.normal(k1, (D, H), dtype=jnp.float32) * 0.05
    b1 = jax.random.normal(kb1, (H,), dtype=jnp.float32) * 0.05
    w2 = jax.random.normal(k2, (H, D), dtype=jnp.float32) * 0.05
    b2 = jax.random.normal(kb2, (D,), dtype=jnp.float32) * 0.05

    params = prepare_ff_params(w1, b1, w2, b2)   # pad + bf16 cast, hoisted
    ref = residual_feedforward_ref(x, w1, b1, w2, b2)

    # Fast path: fully-resident (single-buffered) weights, 1-D row grid.
    out = jax.block_until_ready(residual_feedforward(x, params))
    assert out.shape == x.shape and out.dtype == x.dtype
    # bf16 MXU operands / bf16 GELU epilogue with f32 accumulate & residual.
    assert jnp.allclose(out, ref, atol=3e-2, rtol=3e-2), "resident path mismatch"

    # Hidden-dim tiled fallback path (forced here: th=128 -> 2 h-steps).
    out_t = jax.block_until_ready(
        residual_feedforward(x, params, force_h_tiled=True, th=128))
    assert jnp.allclose(out_t, ref, atol=3e-2, rtol=3e-2), "h-tiled path mismatch"

    print("KERNEL_OK")
</pallas_src>

<mosaic_0001>
module attributes {stable_mosaic.version = 11 : i64} {
  func.func @_residual_ff_kernel(%arg0: i32, %arg1: memref<16x128xf32, #tpu.memory_space<vmem>>, %arg2: memref<128x256xbf16, #tpu.memory_space<vmem>>, %arg3: memref<1x256xf32, #tpu.memory_space<vmem>>, %arg4: memref<256x128xbf16, #tpu.memory_space<vmem>>, %arg5: memref<1x128xf32, #tpu.memory_space<vmem>>, %arg6: memref<16x128xf32, #tpu.memory_space<vmem>>) attributes {dimension_semantics = [#tpu.dimension_semantics<parallel>], iteration_bounds = array<i64: 1>, scalar_prefetch = 0 : i64, scratch_operands = 0 : i64, tpu.core_type = #tpu.core_type<tc>, window_params = [{transform_indices = @transform_0, window_bounds = array<i64: 16, 128>}, {pipeline_mode = #tpu.pipeline_mode<synchronous>, transform_indices = @transform_1, window_bounds = array<i64: 128, 256>}, {pipeline_mode = #tpu.pipeline_mode<synchronous>, transform_indices = @transform_2, window_bounds = array<i64: 1, 256>}, {pipeline_mode = #tpu.pipeline_mode<synchronous>, transform_indices = @transform_3, window_bounds = array<i64: 256, 128>}, {pipeline_mode = #tpu.pipeline_mode<synchronous>, transform_indices = @transform_4, window_bounds = array<i64: 1, 128>}, {transform_indices = @transform_5, window_bounds = array<i64: 16, 128>}]} {
    %c0 = arith.constant 0 : index
    %c0_0 = arith.constant 0 : index
    %0 = vector.load %arg1[%c0, %c0_0] : memref<16x128xf32, #tpu.memory_space<vmem>>, vector<16x128xf32>
    %1 = arith.truncf %0 : vector<16x128xf32> to vector<16x128xbf16>
    %c0_1 = arith.constant 0 : index
    %c0_2 = arith.constant 0 : index
    %2 = vector.load %arg2[%c0_1, %c0_2] : memref<128x256xbf16, #tpu.memory_space<vmem>>, vector<128x256xbf16>
    %cst = arith.constant dense<0.000000e+00> : vector<16x256xf32>
    %3 = tpu.matmul %1, %2, %cst {dimension_numbers = #tpu.dot_dimension_numbers<[1], [0], [0], [1], [0, 0, 1, 1], [], []>} : vector<16x128xbf16>, vector<128x256xbf16>, vector<16x256xf32> -> vector<16x256xf32>
    %c0_3 = arith.constant 0 : index
    %c0_4 = arith.constant 0 : index
    %4 = vector.load %arg3[%c0_3, %c0_4] : memref<1x256xf32, #tpu.memory_space<vmem>>, vector<1x256xf32>
    %5 = vector.broadcast %4 : vector<1x256xf32> to vector<16x256xf32>
    %6 = arith.addf %3, %5 : vector<16x256xf32>
    %7 = arith.mulf %6, %6 : vector<16x256xf32>
    %8 = arith.mulf %6, %7 : vector<16x256xf32>
    %cst_5 = arith.constant 4.471500e-02 : f32
    %9 = vector.broadcast %cst_5 : f32 to vector<16x256xf32>
    %10 = arith.mulf %9, %8 : vector<16x256xf32>
    %11 = arith.addf %6, %10 : vector<16x256xf32>
    %cst_6 = arith.constant 0.797884583 : f32
    %12 = vector.broadcast %cst_6 : f32 to vector<16x256xf32>
    %13 = arith.mulf %12, %11 : vector<16x256xf32>
    %14 = math.tanh %13 : vector<16x256xf32>
    %cst_7 = arith.constant 1.000000e+00 : f32
    %15 = vector.broadcast %cst_7 : f32 to vector<16x256xf32>
    %16 = arith.addf %15, %14 : vector<16x256xf32>
    %cst_8 = arith.constant 5.000000e-01 : f32
    %17 = vector.broadcast %cst_8 : f32 to vector<16x256xf32>
    %18 = arith.mulf %17, %16 : vector<16x256xf32>
    %19 = arith.mulf %6, %18 : vector<16x256xf32>
    %20 = arith.truncf %19 : vector<16x256xf32> to vector<16x256xbf16>
    %c0_9 = arith.constant 0 : index
    %c0_10 = arith.constant 0 : index
    %21 = vector.load %arg4[%c0_9, %c0_10] : memref<256x128xbf16, #tpu.memory_space<vmem>>, vector<256x128xbf16>
    %cst_11 = arith.constant dense<0.000000e+00> : vector<16x128xf32>
    %22 = tpu.matmul %20, %21, %cst_11 {dimension_numbers = #tpu.dot_dimension_numbers<[1], [0], [0], [1], [0, 0, 1, 1], [], []>} : vector<16x256xbf16>, vector<256x128xbf16>, vector<16x128xf32> -> vector<16x128xf32>
    %c0_12 = arith.constant 0 : index
    %c0_13 = arith.constant 0 : index
    %23 = vector.load %arg5[%c0_12, %c0_13] : memref<1x128xf32, #tpu.memory_space<vmem>>, vector<1x128xf32>
    %24 = vector.broadcast %23 : vector<1x128xf32> to vector<16x128xf32>
    %25 = arith.addf %22, %24 : vector<16x128xf32>
    %26 = arith.addf %25, %0 : vector<16x128xf32>
    %c0_14 = arith.constant 0 : index
    %c0_15 = arith.constant 0 : index
    %27 = vector.load %arg6[%c0_14, %c0_15] : memref<16x128xf32, #tpu.memory_space<vmem>>, vector<16x128xf32>
    tpu.vector_store %arg6[%c0_14, %c0_15], %26 {strides = array<i32>} : memref<16x128xf32, #tpu.memory_space<vmem>>, vector<16x128xf32>,
    return
  }
  func.func @transform_0(%arg0: i32) -> (i32, i32) {
    %c0_i32 = arith.constant 0 : i32
    %c0_i32_0 = arith.constant 0 : i32
    return %arg0, %c0_i32 : i32, i32
  }
  func.func @transform_1(%arg0: i32) -> (i32, i32) {
    %c0_i32 = arith.constant 0 : i32
    %c0_i32_0 = arith.constant 0 : i32
    %c0_i32_1 = arith.constant 0 : i32
    return %c0_i32, %c0_i32_0 : i32, i32
  }
  func.func @transform_2(%arg0: i32) -> (i32, i32) {
    %c0_i32 = arith.constant 0 : i32
    %c0_i32_0 = arith.constant 0 : i32
    %c0_i32_1 = arith.constant 0 : i32
    return %c0_i32, %c0_i32_0 : i32, i32
  }
  func.func @transform_3(%arg0: i32) -> (i32, i32) {
    %c0_i32 = arith.constant 0 : i32
    %c0_i32_0 = arith.constant 0 : i32
    %c0_i32_1 = arith.constant 0 : i32
    return %c0_i32, %c0_i32_0 : i32, i32
  }
  func.func @transform_4(%arg0: i32) -> (i32, i32) {
    %c0_i32 = arith.constant 0 : i32
    %c0_i32_0 = arith.constant 0 : i32
    %c0_i32_1 = arith.constant 0 : i32
    return %c0_i32, %c0_i32_0 : i32, i32
  }
  func.func @transform_5(%arg0: i32) -> (i32, i32) {
    %c0_i32 = arith.constant 0 : i32
    %c0_i32_0 = arith.constant 0 : i32
    return %arg0, %c0_i32 : i32, i32
  }
}

</mosaic_0001>

<bundles_post_ra>
// kernel: tpu_custom_call.1
= control target key start
LH: loop header
LB: loop body
LE: loop exit
PB: predicated region body
PF: predicated region fallthrough
CT: control target
= control target key end

     0   :  { %10 = vsyncpa [#allocation3], 0  ;;  %s776_s0 = inlined_call_operand.hbm [shape: f32[16,128], index: 0, kind: input, shape index: {}]   ;;  %s777_s1 = inlined_call_operand.hbm [shape: bf16[128,256], index: 1, kind: input, shape index: {}]   ;;  %s778_s2 = inlined_call_operand.vmem [shape: f32[1,256], index: 2, kind: input, shape index: {}]   ;;  %s779_s3 = inlined_call_operand.hbm [shape: bf16[256,128], index: 3, kind: input, shape index: {}]   ;;  %s780_s4 = inlined_call_operand.vmem [shape: f32[1,128], index: 4, kind: input, shape index: {}]   ;;  %s781_s5 = inlined_call_operand.hbm [shape: f32[16,128], index: 5, kind: output, shape index: {}]  }
   0x1   :  { %11 = vsyncpa [#allocation6], 0 }
   0x2   :  { %12 = vsyncpa [#allocation4], 0  ;;  %s659_s18 = smov [#allocation5]   ;;  %s660_s20 = smov [#allocation2]  }
   0x3   :  { %s30_s19 = sshll.u32 %s659_s18, 4  ;;  %s18_s21 = sshll.u32 %s660_s20, 4  ;;  %s31_s19 = int_to_ptr.vmem [resolvable:$true] %s30_s19  ;;  %s698_s21 = int_to_ptr.vmem [resolvable:$true] %s18_s21 }
   0x4   :  { %s565_s24 = scalar_lea.hbm %s777_s1, 2048 }
   0x5   :  { %p566_p0 = scmp.ne.s32.totalorder %s777_s1, %s565_s24  ;;  %p569_p1 = scmp.lt.u32.totalorder %s565_s24, %s777_s1 }
   0x7   :  { %p571_p2 = pnand %p569_p1, %p566_p0 }
   0x9   :  { %574 = shalt.err (!%p571_p2)
}
   0xa   :  { %s575_s29 = scalar_lea.vmem %s31_s19, 2048  ;;  %p580_p4 = scmp.lt.s32.totalorder %s31_s19, %s31_s19 }
   0xb   :  { %p576_p3 = scmp.ne.s32.totalorder %s31_s19, %s575_s29  ;;  %p581_p5 = scmp.lt.s32.totalorder %s575_s29, %s575_s29 }
   0xd   :  { %p582_p6 = por %p581_p5, %p580_p4 }
   0xf   :  { %p583_p7 = pnand %p582_p6, %p576_p3 }
  0x11   :  { %586 = shalt.err (!%p583_p7)
}
  0x12   :  { %s661_s30 = smov 128   ;;  %s662_s6 = smov 8  }
  0x13   :  { %36 = dma.hbm_to_vmem [thread:$0]  %s777_s1, 2048, %s31_s19, [#allocation6], %s661_s30, %s661_s30, %s662_s6  }
  0x14   :  { %s587_s11 = scalar_lea.hbm %s776_s0, 256 }
  0x15   :  { %p588_p8 = scmp.ne.s32.totalorder %s776_s0, %s587_s11  ;;  %p591_p9 = scmp.lt.u32.totalorder %s587_s11, %s776_s0 }
  0x17   :  { %p593_p10 = pnand %p591_p9, %p588_p8 }
  0x19   :  { %596 = shalt.err (!%p593_p10)
}
  0x1a   :  { %s597_s16 = scalar_lea.vmem %s698_s21, 256  ;;  %p602_p12 = scmp.lt.s32.totalorder %s698_s21, %s698_s21 }
  0x1b   :  { %p598_p11 = scmp.ne.s32.totalorder %s698_s21, %s597_s16  ;;  %p603_p13 = scmp.lt.s32.totalorder %s597_s16, %s597_s16 }
  0x1d   :  { %p604_p0 = por %p603_p13, %p602_p12 }
  0x1f   :  { %p605_p1 = pnand %p604_p0, %p598_p11 }
  0x21   :  { %608 = shalt.err (!%p605_p1)
}
  0x22   :  { %24 = dma.hbm_to_vmem [thread:$0]  %s776_s0, 256, %s698_s21, [#allocation3], %s661_s30, %s661_s30, %s662_s6  }
  0x23   :  { %s663_s18 = smov [#allocation7]   ;;  %s609_s23 = scalar_lea.hbm %s779_s3, 2048 }
  0x24   :  { %s44_s19 = sshll.u32 %s663_s18, 4  ;;  %p610_p2 = scmp.ne.s32.totalorder %s779_s3, %s609_s23  ;;  %s45_s19 = int_to_ptr.vmem [resolvable:$true] %s44_s19 }
  0x25   :  { %p613_p3 = scmp.lt.u32.totalorder %s609_s23, %s779_s3 }
  0x27   :  { %p615_p4 = pnand %p613_p3, %p610_p2 }
  0x29   :  { %618 = shalt.err (!%p615_p4)
}
  0x2a   :  { %s619_s28 = scalar_lea.vmem %s45_s19, 2048  ;;  %p624_p6 = scmp.lt.s32.totalorder %s45_s19, %s45_s19 }
  0x2b   :  { %p620_p5 = scmp.ne.s32.totalorder %s45_s19, %s619_s28  ;;  %p625_p7 = scmp.lt.s32.totalorder %s619_s28, %s619_s28 }
  0x2d   :  { %p626_p8 = por %p625_p7, %p624_p6 }
  0x2f   :  { %p627_p9 = pnand %p626_p8, %p620_p5 }
  0x31   :  { %630 = shalt.err (!%p627_p9)
}
  0x32   :  { %s664_s0 = smov 64   ;;  %s665_s21 = smov 4  }
  0x33   :  { %50 = dma.hbm_to_vmem [thread:$0]  %s779_s3, 2048, %s45_s19, [#allocation6], %s664_s0, %s664_s0, %s665_s21  }
  0x34   :  { %653 = dma.done.wait [#allocation3], 256  }
  0x35   :  { %654 = vsyncadd [#allocation3], 4294967040 }
  0x36   :  { %655 = dma.done.wait [#allocation6], 4096  }
  0x37   :  { %656 = vsyncadd [#allocation6], 4294963200  ;;  %v666_v0 = vmov 0   ;;  %v517_v1 = vld [vmem:[#allocation5 + $0x4] ss:$8 sps:$4 sm:$0xff]   ;;  %v747_v17 = vld [vmem:[#allocation2] sm:$0xff]  ;;  %v84_v36 = vlaneseq }
  0x38   :  { %206 = vmatprep.mubr.bf16.mxu0 %v666_v0  ;;  %v519_v2 = vld [vmem:[#allocation5] ss:$8 sps:$4 sm:$0xff]   ;;  %174 = vmatprep.subr.bf16.mxu0 %v517_v1  ;;  %v520_v3 = vld [vmem:[#allocation5 + $0x14] ss:$8 sps:$4 sm:$0xff]   ;;  %v522_v4 = vld [vmem:[#allocation5 + $0x10] ss:$8 sps:$4 sm:$0xff]  }
  0x39   :  { %175 = vmatpush1.bf16.msra.mxu0 %v519_v2  ;;  %v523_v5 = vld [vmem:[#allocation5 + $0x24] ss:$8 sps:$4 sm:$0xff]   ;;  %v525_v6 = vld [vmem:[#allocation5 + $0x20] ss:$8 sps:$4 sm:$0xff]   ;;  %v526_v7 = vld [vmem:[#allocation5 + $0x34] ss:$8 sps:$4 sm:$0xff]  }
  0x3a   :  { %176 = vmatprep.subr.bf16.mxu0 %v520_v3  ;;  %v528_v8 = vld [vmem:[#allocation5 + $0x30] ss:$8 sps:$4 sm:$0xff]   ;;  %v529_v9 = vld [vmem:[#allocation5 + $0x44] ss:$8 sps:$4 sm:$0xff]   ;;  %v531_v10 = vld [vmem:[#allocation5 + $0x40] ss:$8 sps:$4 sm:$0xff]  }
  0x3b   :  { %v532_v11 = vld [vmem:[#allocation5 + $0x54] ss:$8 sps:$4 sm:$0xff]   ;;  %v534_v12 = vld [vmem:[#allocation5 + $0x50] ss:$8 sps:$4 sm:$0xff]   ;;  %v535_v13 = vld [vmem:[#allocation5 + $0x64] ss:$8 sps:$4 sm:$0xff]  }
  0x3c   :  { %v537_v14 = vld [vmem:[#allocation5 + $0x60] ss:$8 sps:$4 sm:$0xff]   ;;  %v538_v15 = vld [vmem:[#allocation5 + $0x74] ss:$8 sps:$4 sm:$0xff]   ;;  %v540_v16 = vld [vmem:[#allocation5 + $0x70] ss:$8 sps:$4 sm:$0xff]  }
  0x3d   :  { %177 = vmatpush1.bf16.msra.mxu0 %v522_v4  ;;  %v749_v18 = vld [vmem:[#allocation2 + $0x8] sm:$0xff]  ;;  %v541_v20 = vld [vmem:[#allocation7 + $0x40] sm:$0xff]   ;;  %v543_v22 = vld [vmem:[#allocation7 + $0x48] sm:$0xff]   ;;  %v85_v37 = vshrl.u32 %v84_v36, 7  ;;  %s667_s10 = smov [#allocation8]  }
  0x3e   :  { %178 = vmatprep.subr.bf16.mxu0 %v523_v5  ;;  %v65_v19 = vpack.c.bf16 %v749_v18, %v747_v17  ;;  %v542_v21 = vld [vmem:[#allocation7] sm:$0xff]   ;;  %486 = vmatprep.subr.bf16.mxu1 %v541_v20  ;;  %v544_v23 = vld [vmem:[#allocation7 + $0x8] sm:$0xff]   ;;  %v545_v24 = vld [vmem:[#allocation7 + $0x50] sm:$0xff]   ;;  %s440_s11 = sshll.u32 %s667_s10, 4  ;;  %s441_s11 = int_to_ptr.vmem [resolvable:$true] %s440_s11 }
  0x3f   :  { %487 = vmatpush3.bf16.msra.mxu1 %v542_v21  ;;  %v546_v25 = vld [vmem:[#allocation7 + $0x10] sm:$0xff]   ;;  %v547_v26 = vld [vmem:[#allocation7 + $0x58] sm:$0xff]   ;;  %v549_v28 = vld [vmem:[#allocation7 + $0x60] sm:$0xff]   ;;  %v86_v38 = vsub.s32 0, %v85_v37  ;;  %v90_v40 = vsub.s32 1, %v85_v37  ;;  %s631_s12 = scalar_lea.vmem %s441_s11, 256  ;;  %p636_p11 = scmp.lt.s32.totalorder %s441_s11, %s441_s11 }
  0x40   :  { %488 = vmatprep.subr.bf16.mxu1 %v543_v22  ;;  %v548_v27 = vld [vmem:[#allocation7 + $0x18] sm:$0xff]   ;;  %v550_v29 = vld [vmem:[#allocation7 + $0x20] sm:$0xff]   ;;  %v551_v30 = vld [vmem:[#allocation7 + $0x68] sm:$0xff]   ;;  %p632_p10 = scmp.ne.s32.totalorder %s441_s11, %s631_s12  ;;  %p637_p12 = scmp.lt.s32.totalorder %s631_s12, %s631_s12 }
  0x41   :  { %179 = vmatpush1.bf16.msra.mxu0 %v525_v6  ;;  %v552_v31 = vld [vmem:[#allocation7 + $0x28] sm:$0xff]   ;;  %v553_v32 = vld [vmem:[#allocation7 + $0x70] sm:$0xff]   ;;  %v555_v34 = vld [vmem:[#allocation7 + $0x78] sm:$0xff]  }
  0x42   :  { %180 = vmatprep.subr.bf16.mxu0 %v526_v7  ;;  %v554_v33 = vld [vmem:[#allocation7 + $0x30] sm:$0xff]   ;;  %v556_v35 = vld [vmem:[#allocation7 + $0x38] sm:$0xff]   ;;  %p638_p13 = por %p637_p12, %p636_p11 }
  0x43   :  { %489 = vmatpush3.bf16.msra.mxu1 %v544_v23  ;;  %v82_v39 = vld [vmem:[%s778_s2] sm:$0x3] }
  0x44   :  { %490 = vmatprep.subr.bf16.mxu1 %v545_v24  ;;  %v87_v41 = vrot.slane %v82_v39, %v86_v38  ;;  %v91_v42 = vrot.slane %v82_v39, %v90_v40  ;;  %p639_p0 = pnand %p638_p13, %p632_p10 }
  0x45   :  { %181 = vmatpush1.bf16.msra.mxu0 %v528_v8 }
  0x46   :  { %182 = vmatprep.subr.bf16.mxu0 %v529_v9 }
  0x47   :  { %491 = vmatpush3.bf16.msra.mxu1 %v546_v25 }
  0x48   :  { %492 = vmatprep.subr.bf16.mxu1 %v547_v26 }
  0x49   :  { %183 = vmatpush1.bf16.msra.mxu0 %v531_v10 }
  0x4a   :  { %184 = vmatprep.subr.bf16.mxu0 %v532_v11 }
  0x4b   :  { %493 = vmatpush3.bf16.msra.mxu1 %v548_v27 }
  0x4c   :  { %494 = vmatprep.subr.bf16.mxu1 %v549_v28  ;;  %v469_v28 = vld [vmem:[%s780_s4] ss:$0 sm:$0xff] }
  0x4d   :  { %185 = vmatpush1.bf16.msra.mxu0 %v534_v12 }
  0x4e   :  { %186 = vmatprep.subr.bf16.mxu0 %v535_v13 }
  0x4f   :  { %495 = vmatpush3.bf16.msra.mxu1 %v550_v29 }
  0x50   :  { %496 = vmatprep.subr.bf16.mxu1 %v551_v30 }
  0x51   :  { %187 = vmatpush1.bf16.msra.mxu0 %v537_v14 }
  0x52   :  { %188 = vmatprep.subr.bf16.mxu0 %v538_v15 }
  0x53   :  { %497 = vmatpush3.bf16.msra.mxu1 %v552_v31 }
  0x54   :  { %498 = vmatprep.subr.bf16.mxu1 %v553_v32 }
  0x55   :  { %189 = vmatpush1.bf16.msra.mxu0 %v540_v16 }
  0x57   :  { %499 = vmatpush3.bf16.msra.mxu1 %v554_v33 }
  0x58   :  { %207 = vmatmul.mubr.bf16.vlgmr.msra.gmra.mrb[0].mxu0 %v65_v19  ;;  %500 = vmatprep.subr.bf16.mxu1 %v555_v34 }
  0x5b   :  { %501 = vmatpush3.bf16.msra.mxu1 %v556_v35 }
 0x12b   :  { %v208_v43 = vpop.f32.mrb[0].mxu0 }
 0x12c   :  { %v209_v44 = vadd.f32 %v208_v43, %v87_v41  ;;  %v210_v45 = vpop.f32.mrb[1].mxu0 }
 0x12d   :  { %v211_v46 = vadd.f32 %v210_v45, %v91_v42  ;;  %v212_v47 = vpop.f32.mrb[2].mxu0 }
 0x12e   :  { %v217_v48 = vmul.f32 %v209_v44, %v209_v44  ;;  %v213_v49 = vadd.f32 %v212_v47, %v87_v41  ;;  %v214_v50 = vpop.f32.mrb[3].mxu0 }
 0x12f   :  { %v218_v51 = vmul.f32 %v211_v46, %v211_v46  ;;  %v215_v52 = vadd.f32 %v214_v50, %v91_v42 }
 0x130   :  { %v221_v53 = vmul.f32 %v217_v48, %v209_v44  ;;  %v219_v54 = vmul.f32 %v213_v49, %v213_v49 }
 0x131   :  { %v222_v55 = vmul.f32 %v218_v51, %v211_v46  ;;  %v220_v56 = vmul.f32 %v215_v52, %v215_v52 }
 0x132   :  { %v225_v57 = vmul.f32 0.044715, %v221_v53  ;;  %v223_v58 = vmul.f32 %v219_v54, %v213_v49 }
 0x133   :  { %v226_v59 = vmul.f32 0.044715, %v222_v55  ;;  %v224_v60 = vmul.f32 %v220_v56, %v215_v52 }
 0x134   :  { %v229_v61 = vadd.f32 %v225_v57, %v209_v44  ;;  %v227_v62 = vmul.f32 0.044715, %v223_v58 }
 0x135   :  { %v228_v63 = vmul.f32 0.044715, %v224_v60  ;;  %v230_v0 = vadd.f32 %v226_v59, %v211_v46 }
 0x136   :  { %v233_v1 = vmul.f32 0.7978846, %v229_v61  ;;  %v231_v2 = vadd.f32 %v227_v62, %v213_v49 }
 0x137   :  { %v232_v3 = vadd.f32 %v228_v63, %v215_v52  ;;  %v234_v4 = vmul.f32 0.7978846, %v230_v0 }
 0x138   :  { %557 = vtanh.f32 %v233_v1  ;;  %v235_v5 = vmul.f32 0.7978846, %v231_v2 }
 0x139   :  { %v236_v6 = vmul.f32 0.7978846, %v232_v3  ;;  %559 = vtanh.f32 %v234_v4 }
 0x13a   :  { %561 = vtanh.f32 %v235_v5 }
 0x13b   :  { %563 = vtanh.f32 %v236_v6 }
 0x142   :  { %v558_v7 = vpop.eup %557 }
 0x143   :  { %v560_v8 = vpop.eup %559  ;;  %v241_v9 = vadd.f32 1.0, %v558_v7 }
 0x144   :  { %v562_v10 = vpop.eup %561  ;;  %v242_v11 = vadd.f32 1.0, %v560_v8 }
 0x145   :  { %v564_v12 = vpop.eup %563  ;;  %v243_v13 = vadd.f32 1.0, %v562_v10  ;;  %v245_v14 = vmul.f32 0.5, %v241_v9 }
 0x146   :  { %v244_v15 = vadd.f32 1.0, %v564_v12  ;;  %v246_v16 = vmul.f32 0.5, %v242_v11 }
 0x147   :  { %v247_v19 = vmul.f32 0.5, %v243_v13  ;;  %v249_v21 = vmul.f32 %v245_v14, %v209_v44 }
 0x148   :  { %v248_v20 = vmul.f32 0.5, %v244_v15  ;;  %v250_v23 = vmul.f32 %v246_v16, %v211_v46 }
 0x149   :  { %v251_v22 = vmul.f32 %v247_v19, %v213_v49 }
 0x14a   :  { %v252_v24 = vmul.f32 %v248_v20, %v215_v52 }
 0x14b   :  { %v253_v25 = vpack.c.bf16 %v251_v22, %v249_v21 }
 0x14c   :  { %v254_v26 = vpack.c.bf16 %v252_v24, %v250_v23 }
 0x14e   :  { %422 = vmatprep.mubr.bf16.mxu1 %v254_v26 }
 0x14f   :  { %423 = vmatmul.mubr.bf16.vlgmr.msra.gmra.mrb[0].mxu1 %v253_v25 }
 0x222   :  { %v502_v27 = vpop.f32.mrb[0].mxu1 }
 0x223   :  { %v503_v29 = vpop.f32.mrb[1].mxu1 }
 0x224   :  { %v504_v30 = vadd.f32 %v503_v29, %v502_v27  ;;  %v505_v31 = vpop.f32.mrb[2].mxu1 }
 0x225   :  { %v506_v32 = vpop.f32.mrb[3].mxu1 }
 0x226   :  { %v425_v33 = vadd.f32 %v504_v30, %v469_v28  ;;  %v507_v34 = vadd.f32 %v506_v32, %v505_v31 }
 0x228   :  { %v431_v35 = vadd.f32 %v425_v33, %v747_v17  ;;  %v428_v36 = vadd.f32 %v507_v34, %v469_v28 }
 0x22a   :  { %433 = vst [vmem:[#allocation8] sm:$0xff] %v431_v35  ;;  %v432_v37 = vadd.f32 %v428_v36, %v749_v18 }
 0x22c   :  { %434 = vst [vmem:[#allocation8 + $0x8] sm:$0xff] %v432_v37 }
 0x22d   :  { %642 = shalt.err (!%p639_p0)
}
 0x22e   :  { %s643_s14 = scalar_lea.hbm %s781_s5, 256 }
 0x22f   :  { %p644_p1 = scmp.ne.s32.totalorder %s781_s5, %s643_s14  ;;  %p647_p2 = scmp.lt.u32.totalorder %s643_s14, %s781_s5 }
 0x231   :  { %p649_p3 = pnand %p647_p2, %p644_p1 }
 0x233   :  { %652 = shalt.err (!%p649_p3)
}
 0x234   :  { %446 = dma.vmem_to_hbm [thread:$0]  %s441_s11, 256, %s781_s5, [#allocation4], %s661_s30, %s661_s30, %s662_s6  }
 0x235   :  { %657 = dma.done.wait [#allocation4], 256  }
 0x236   :  { %658 = vsyncadd [#allocation4], 4294967040 }
 0x237   :  { %450 = vsyncpa [#allocation3], 1 }
 0x238   :  { %451 = vsyncpa [#allocation6], 1 }
 0x239   :  { %452 = vsyncpa [#allocation4], 1 }

</bundles_post_ra>
